<compile_context>
chip_gen: v5e
topology: v5e:2x2
jax: 0.10.0
libtpu: 0.0.40
codegen_flags: <defaults>
</compile_context>

<pallas_src>
import math

import jax
import jax.numpy as jnp
from jax.experimental import pallas as pl
from jax.experimental.pallas import tpu as pltpu


def _build_pe_table(d_model, max_len=5000):
    """Pure-JAX reference table, identical formula to the PyTorch module."""
    position = jnp.arange(max_len, dtype=jnp.float32)[:, None]
    div_term = jnp.exp(
        jnp.arange(0, d_model, 2, dtype=jnp.float32) * (-math.log(10000.0) / d_model)
    )
    angles = position * div_term
    pe = jnp.zeros((max_len, d_model), dtype=jnp.float32)
    pe = pe.at[:, 0::2].set(jnp.sin(angles))
    pe = pe.at[:, 1::2].set(jnp.cos(angles))
    return pe[:, None, :]  # (max_len, 1, d_model)


def _per_feature_constants(d_model):
    # pe[pos, d] = sin(pos * inv_freq[d] + phase[d]),
    # phase = 0 on even feature columns, pi/2 on odd columns (sin -> cos).
    d = jnp.arange(d_model, dtype=jnp.int32)
    d_even = (d - (d % 2)).astype(jnp.float32)                   # 2*(d//2)
    inv_freq = jnp.exp(d_even * (-math.log(10000.0) / d_model))  # (D,)
    phase = (d % 2).astype(jnp.float32) * (math.pi / 2.0)        # (D,)
    return inv_freq, phase


def _pe_add_kernel_2d(x_ref, inv_freq_ref, phase_ref, o_ref):
    # x_ref / o_ref: (tile_s, B*D); inv_freq_ref / phase_ref: (1, B*D)
    tile_s = x_ref.shape[0]
    row0 = pl.program_id(0) * tile_s
    # (tile_s, 1) column of global sequence positions; broadcasts across lanes.
    pos = (row0 + jax.lax.broadcasted_iota(jnp.int32, (tile_s, 1), 0)
           ).astype(jnp.float32)
    # Single transcendental per element.
    pe = jnp.sin(pos * inv_freq_ref[...] + phase_ref[...])
    o_ref[...] = (x_ref[...] + pe).astype(o_ref.dtype)


def _pe_add_kernel_3d(x_ref, inv_freq_ref, phase_ref, o_ref):
    # x_ref / o_ref: (tile_s, B, D); inv_freq_ref / phase_ref: (1, 1, D)
    # PE is batch-independent: compute it once per position and broadcast
    # across the batch (sublane) axis -> B-fold fewer EUP/VPU PE ops.
    tile_s = x_ref.shape[0]
    row0 = pl.program_id(0) * tile_s
    pos = (row0 + jax.lax.broadcasted_iota(jnp.int32, (tile_s, 1, 1), 0)
           ).astype(jnp.float32)
    pe = jnp.sin(pos * inv_freq_ref[...] + phase_ref[...])        # (tile_s, 1, D)
    o_ref[...] = (x_ref[...] + pe).astype(o_ref.dtype)


def _pick_tile_s(S, row_bytes):
    """Sequence-axis tile: ~4 MiB per x tile (double-buffered in+out ~16 MiB of
    VMEM -> fits every generation incl. v7x), never a degenerate 1-step grid
    when there is enough work, and an even step count when achievable."""
    target_tile_bytes = 4 * 1024 * 1024
    tile_s = (target_tile_bytes // max(row_bytes, 1)) // 8 * 8
    tile_s = max(8, min(tile_s, S))
    if S >= 32:
        # Keep >= 4 pipeline steps so DMA/compute overlap survives and the
        # v7x second TensorCore has work to take.
        tile_s = min(tile_s, max(8, (S // 4) // 8 * 8))
    n_steps = pl.cdiv(S, tile_s)
    if n_steps > 2 and n_steps % 2 == 1:
        # Best-effort even step count (load-balances the two v7x TensorCores).
        tile_s = max(8, ((pl.cdiv(S, n_steps + 1) + 7) // 8) * 8)
    return tile_s


def positional_encoding_forward(x):
    """x: (S, B, D) float32. Returns x + PE[:S] (PositionalEncoding.forward)."""
    S, B, D = x.shape
    inv_freq, phase = _per_feature_constants(D)

    if D % 128 == 0:
        # Lane-dense along D; PE computed once per position, broadcast over B.
        row_bytes = B * D * x.dtype.itemsize
        tile_s = _pick_tile_s(S, row_bytes)
        grid = (pl.cdiv(S, tile_s),)
        kernel = _pe_add_kernel_3d
        operands = (x, inv_freq.reshape(1, 1, D), phase.reshape(1, 1, D))
        in_specs = [
            pl.BlockSpec((tile_s, B, D), lambda i: (i, 0, 0)),
            pl.BlockSpec((1, 1, D), lambda i: (0, 0, 0)),
            pl.BlockSpec((1, 1, D), lambda i: (0, 0, 0)),
        ]
        out_spec = pl.BlockSpec((tile_s, B, D), lambda i: (i, 0, 0))
        out_shape = jax.ShapeDtypeStruct((S, B, D), x.dtype)
    else:
        # Fold (B, D) into one lane axis: most lane-dense 2D view available.
        W = B * D
        row_bytes = W * x.dtype.itemsize
        tile_s = _pick_tile_s(S, row_bytes)
        grid = (pl.cdiv(S, tile_s),)
        kernel = _pe_add_kernel_2d
        operands = (
            x.reshape(S, W),
            jnp.tile(inv_freq, B).reshape(1, W),
            jnp.tile(phase, B).reshape(1, W),
        )
        in_specs = [
            pl.BlockSpec((tile_s, W), lambda i: (i, 0)),
            pl.BlockSpec((1, W), lambda i: (0, 0)),
            pl.BlockSpec((1, W), lambda i: (0, 0)),
        ]
        out_spec = pl.BlockSpec((tile_s, W), lambda i: (i, 0))
        out_shape = jax.ShapeDtypeStruct((S, W), x.dtype)

    # Right-size the scoped VMEM request: 2x double-buffered (in + out) tiles
    # plus headroom; stays far below v7x's 64 MiB per-core VMEM.
    tile_bytes = tile_s * row_bytes
    vmem_limit = int(min(100 * 1024 * 1024,
                         max(8 * 1024 * 1024, 4 * tile_bytes + 2 * 1024 * 1024)))

    out = pl.pallas_call(
        kernel,
        out_shape=out_shape,
        grid_spec=pltpu.PrefetchScalarGridSpec(
            num_scalar_prefetch=0,
            grid=grid,
            in_specs=in_specs,
            out_specs=out_spec,
        ),
        compiler_params=pltpu.CompilerParams(
            dimension_semantics=("parallel",),
            vmem_limit_bytes=vmem_limit,
        ),
    )(*operands)

    return out.reshape(S, B, D)


if __name__ == "__main__":
    # Case 1: small spec-sized shapes (2D lane-folded path, single grid step).
    seq_len, batch, d_model = 8, 2, 32
    x = jax.random.normal(jax.random.PRNGKey(0),
                          (seq_len, batch, d_model), dtype=jnp.float32)
    ref = x + _build_pe_table(d_model, max_len=64)[:seq_len]
    out = jax.block_until_ready(jax.jit(positional_encoding_forward)(x))
    assert out.shape == (seq_len, batch, d_model)
    assert jnp.allclose(out, ref, atol=5e-4), "mismatch vs reference (2D path)"

    # Case 2: D a multiple of 128 (3D lane-dense path, multi-step grid).
    seq_len2, batch2, d_model2 = 64, 2, 128
    x2 = jax.random.normal(jax.random.PRNGKey(0),
                           (seq_len2, batch2, d_model2), dtype=jnp.float32)
    ref2 = x2 + _build_pe_table(d_model2, max_len=128)[:seq_len2]
    out2 = jax.block_until_ready(jax.jit(positional_encoding_forward)(x2))
    assert out2.shape == (seq_len2, batch2, d_model2)
    assert jnp.allclose(out2, ref2, atol=5e-4), "mismatch vs reference (3D path)"

    print("KERNEL_OK")
</pallas_src>

<mosaic_0001>
module attributes {stable_mosaic.version = 11 : i64} {
  func.func @_pe_add_kernel_2d(%arg0: i32, %arg1: memref<8x64xf32, #tpu.memory_space<vmem>>, %arg2: memref<1x64xf32, #tpu.memory_space<vmem>>, %arg3: memref<1x64xf32, #tpu.memory_space<vmem>>, %arg4: memref<8x64xf32, #tpu.memory_space<vmem>>) attributes {dimension_semantics = [#tpu.dimension_semantics<parallel>], iteration_bounds = array<i64: 1>, scalar_prefetch = 0 : i64, scratch_operands = 0 : i64, tpu.core_type = #tpu.core_type<tc>, window_params = [{transform_indices = @transform_0, window_bounds = array<i64: 8, 64>}, {pipeline_mode = #tpu.pipeline_mode<synchronous>, transform_indices = @transform_1, window_bounds = array<i64: 1, 64>}, {pipeline_mode = #tpu.pipeline_mode<synchronous>, transform_indices = @transform_2, window_bounds = array<i64: 1, 64>}, {transform_indices = @transform_3, window_bounds = array<i64: 8, 64>}]} {
    %c8_i32 = arith.constant 8 : i32
    %0 = arith.muli %arg0, %c8_i32 : i32
    %1 = tpu.iota {dimensions = array<i32: 0>} : vector<8x1xi32>
    %2 = vector.broadcast %0 : i32 to vector<8x1xi32>
    %3 = arith.addi %2, %1 : vector<8x1xi32>
    %4 = arith.sitofp %3 : vector<8x1xi32> to vector<8x1xf32>
    %c0 = arith.constant 0 : index
    %c0_0 = arith.constant 0 : index
    %5 = vector.load %arg2[%c0, %c0_0] : memref<1x64xf32, #tpu.memory_space<vmem>>, vector<1x64xf32>
    %6 = vector.broadcast %4 : vector<8x1xf32> to vector<8x64xf32>
    %7 = vector.broadcast %5 : vector<1x64xf32> to vector<8x64xf32>
    %8 = arith.mulf %6, %7 : vector<8x64xf32>
    %c0_1 = arith.constant 0 : index
    %c0_2 = arith.constant 0 : index
    %9 = vector.load %arg3[%c0_1, %c0_2] : memref<1x64xf32, #tpu.memory_space<vmem>>, vector<1x64xf32>
    %10 = vector.broadcast %9 : vector<1x64xf32> to vector<8x64xf32>
    %11 = arith.addf %8, %10 : vector<8x64xf32>
    %12 = math.sin %11 : vector<8x64xf32>
    %c0_3 = arith.constant 0 : index
    %c0_4 = arith.constant 0 : index
    %13 = vector.load %arg1[%c0_3, %c0_4] : memref<8x64xf32, #tpu.memory_space<vmem>>, vector<8x64xf32>
    %14 = arith.addf %13, %12 : vector<8x64xf32>
    %c0_5 = arith.constant 0 : index
    %c0_6 = arith.constant 0 : index
    %15 = vector.load %arg4[%c0_5, %c0_6] : memref<8x64xf32, #tpu.memory_space<vmem>>, vector<8x64xf32>
    tpu.vector_store %arg4[%c0_5, %c0_6], %14 {strides = array<i32>} : memref<8x64xf32, #tpu.memory_space<vmem>>, vector<8x64xf32>,
    return
  }
  func.func @transform_0(%arg0: i32) -> (i32, i32) {
    %c0_i32 = arith.constant 0 : i32
    %c0_i32_0 = arith.constant 0 : i32
    return %arg0, %c0_i32 : i32, i32
  }
  func.func @transform_1(%arg0: i32) -> (i32, i32) {
    %c0_i32 = arith.constant 0 : i32
    %c0_i32_0 = arith.constant 0 : i32
    %c0_i32_1 = arith.constant 0 : i32
    return %c0_i32, %c0_i32_0 : i32, i32
  }
  func.func @transform_2(%arg0: i32) -> (i32, i32) {
    %c0_i32 = arith.constant 0 : i32
    %c0_i32_0 = arith.constant 0 : i32
    %c0_i32_1 = arith.constant 0 : i32
    return %c0_i32, %c0_i32_0 : i32, i32
  }
  func.func @transform_3(%arg0: i32) -> (i32, i32) {
    %c0_i32 = arith.constant 0 : i32
    %c0_i32_0 = arith.constant 0 : i32
    return %arg0, %c0_i32 : i32, i32
  }
}

</mosaic_0001>

<bundles_post_ra>
// kernel: tile.19
= control target key start
LH: loop header
LB: loop body
LE: loop exit
PB: predicated region body
PF: predicated region fallthrough
CT: control target
= control target key end

     0   :  { %vm7_vm0 = vcmask 261120   ;;  %vm13_vm1 = vcmask 523520   ;;  %s39_s0 = inlined_call_operand.vmem [shape: f32[2,32], index: 0, kind: input, shape index: {}]   ;;  %s40_s1 = inlined_call_operand.vmem [shape: f32[1,64], index: 1, kind: output, shape index: {}]  }
   0x1   :  { %v4_v0 = vld [vmem:[%s39_s0] sm:$0x3]  ;;  %s22_s0 = smov 32  }
   0x2   :  { %5 = vst [vmem:[#allocation1] sm:$0x3] %v4_v0 }
   0x9   :  { %v10_v1 = vld [vmem:[#allocation1 + $0x1] sm:$0x1]   ;;  %v6_v2 = vld [vmem:[#allocation1] sm:$0x1]  }
   0xa   :  { %11 = vrot.lane.b32.xlu0 %v10_v1, %s22_s0  ;;  %8 = vst.msk [vmem:[#allocation0] sm:$0x1] %vm7_vm0, %v6_v2  }
  0x7c   :  { %v12_v3 = vpop.permute.xlu0 %11  }
  0x7d   :  { %14 = vst.msk [vmem:[#allocation0] sm:$0x1] %vm13_vm1, %v12_v3  }
  0x84   :  { %v17_v4 = vld [vmem:[#allocation0] sm:$0x1] }
  0x85   :  { %20 = vst [vmem:[%s40_s1] sm:$0x1] %v17_v4 }

// kernel: tile.18
= control target key start
LH: loop header
LB: loop body
LE: loop exit
PB: predicated region body
PF: predicated region fallthrough
CT: control target
= control target key end

     0   :  { %s22_s0 = inlined_call_operand.vmem [shape: f32[32], index: 0, kind: input, shape index: {}]   ;;  %s23_s1 = inlined_call_operand.vmem [shape: f32[2,32], index: 1, kind: output, shape index: {}]  }
   0x1   :  { %v4_v0 = vld [vmem:[%s22_s0] ss:$0 sm:$0xff] }
   0x2   :  { %5 = vst [vmem:[%s23_s1] sm:$0x3] %v4_v0 }

// kernel: positional_encoding_forward.1
= control target key start
LH: loop header
LB: loop body
LE: loop exit
PB: predicated region body
PF: predicated region fallthrough
CT: control target
= control target key end

     0   :  { %v15_v0 = vlaneseq  ;;  %v205_v18 = vmov 683565275   ;;  %v206_v20 = vmov 2475754826   ;;  %v207_v22 = vmov 2131351028   ;;  %s290_s1 = inlined_call_operand.vmem [shape: f32[1,64], index: 1, kind: input, shape index: {}]   ;;  %s291_s2 = inlined_call_operand.vmem [shape: f32[1,64], index: 2, kind: input, shape index: {}]   ;;  %s292_s0 = inlined_call_operand.vmem [shape: f32[8,64], index: 0, kind: input, shape index: {}]   ;;  %s293_s3 = inlined_call_operand.vmem [shape: f32[8,64], index: 3, kind: output, shape index: {}]  }
   0x1   :  { %v203_v2 = vld [vmem:[%s290_s1] ss:$0 sm:$0xff]  ;;  %v208_v24 = vmov 2102212464   ;;  %v209_v26 = vmov 920167782  }
   0x2   :  { %v16_v1 = vshrl.u32 %v15_v0, 7  ;;  %v204_v4 = vld [vmem:[%s291_s2] ss:$0 sm:$0xff]  ;;  %v210_v32 = vmov 1326507024  }
   0x4   :  { %v19_v3 = vcvt.s32.f32 %v16_v1 }
   0x6   :  { %v24_v5 = vmul.f32 %v203_v2, %v19_v3 }
   0x8   :  { %v238_v6 = vadd.f32 %v204_v4, %v24_v5 }
   0xa   :  { %v33_v7 = vand.u32 2139095040, %v238_v6  ;;  %v30_v9 = vand.u32 2147483647, %v238_v6  ;;  %vm32_vm12 = vcmp.lt.s32.totalorder %v238_v6, 0 }
   0xc   :  { %v34_v8 = vshrl.u32 %v33_v7, 23  ;;  %v37_v12 = vand.u32 8388607, %v30_v9  ;;  %v211_v7 = vmov 0   ;;  %vm31_vm13 = vcmp.le.f32.partialorder %v30_v9, 0.7853982 }
   0xe   :  { %v193_v10 = vadd.s32 4294967169, %v34_v8  ;;  %v38_v15 = vor.u32 8388608, %v37_v12 }
  0x10   :  { %v40_v11 = vadd.s32 1, %v193_v10  ;;  %v247_v34 = vshll.u32 %v38_v15, 8 }
  0x12   :  { %vm41_vm0 = vcmp.gt.s32.totalorder %v40_v11, 0  ;;  %v79_v46 = vand.u32 65535, %v247_v34  ;;  %v80_v47 = vshrl.u32 %v247_v34, 16 }
  0x13   :  { %v42_v13 = vsel %vm41_vm0, %v40_v11, 0 }
  0x14   :  { %v44_v14 = vand.u32 31, %v42_v13  ;;  %v244_v16 = vshrl.u32 %v42_v13, 5 }
  0x16   :  { %v45_v17 = vsub.s32 32, %v44_v14  ;;  %v47_v19 = vshll.u32 %v205_v18, %v44_v14  ;;  %v50_v21 = vshll.u32 %v206_v20, %v44_v14  ;;  %v53_v23 = vshll.u32 %v207_v22, %v44_v14 }
  0x17   :  { %v56_v25 = vshll.u32 %v208_v24, %v44_v14  ;;  %v59_v27 = vshll.u32 %v209_v26, %v44_v14  ;;  %vm62_vm1 = vcmp.lt.s32.totalorder %v244_v16, 1  ;;  %vm65_vm2 = vcmp.lt.s32.totalorder %v244_v16, 4 }
  0x18   :  { %v48_v28 = vshrl.u32 %v206_v20, %v45_v17  ;;  %v51_v29 = vshrl.u32 %v207_v22, %v45_v17  ;;  %v54_v30 = vshrl.u32 %v208_v24, %v45_v17  ;;  %v57_v31 = vshrl.u32 %v209_v26, %v45_v17 }
  0x19   :  { %v60_v33 = vshrl.u32 %v210_v32, %v45_v17  ;;  %vm64_vm3 = vcmp.lt.s32.totalorder %v244_v16, 3  ;;  %vm63_vm4 = vcmp.lt.s32.totalorder %v244_v16, 2  ;;  %v46_v54 = vshrl.u32 %v205_v18, %v45_v17 }
  0x1a   :  { %v49_v35 = vor.u32 %v48_v28, %v47_v19  ;;  %v52_v36 = vor.u32 %v51_v29, %v50_v21  ;;  %v55_v37 = vor.u32 %v54_v30, %v53_v23  ;;  %v58_v38 = vor.u32 %v57_v31, %v56_v25 }
  0x1b   :  { %v61_v39 = vor.u32 %v60_v33, %v59_v27 }
  0x1c   :  { %v70_v40 = vsel %vm62_vm1, %v49_v35, %v52_v36  ;;  %v74_v41 = vsel %vm62_vm1, %v52_v36, %v55_v37  ;;  %v71_v42 = vsel %vm65_vm2, %v58_v38, 920167782  ;;  %v66_v3 = vsel %vm62_vm1, %v46_v54, %v49_v35 }
  0x1d   :  { %v75_v43 = vsel %vm65_vm2, %v61_v39, 1326507024  ;;  %v72_v44 = vsel %vm64_vm3, %v55_v37, %v71_v42  ;;  %v67_v5 = vsel %vm65_vm2, %v55_v37, 2102212464  ;;  %vm173_vm1 = vweird.f32 %v238_v6 }
  0x1e   :  { %v76_v45 = vsel %vm64_vm3, %v58_v38, %v75_v43  ;;  %v73_v48 = vsel %vm63_vm4, %v70_v40, %v72_v44  ;;  %v68_v18 = vsel %vm64_vm3, %v52_v36, %v67_v5  ;;  %vm187_vm2 = vcmask 523264  }
  0x1f   :  { %v77_v49 = vsel %vm63_vm4, %v74_v41, %v76_v45  ;;  %v103_v52 = vand.u32 65535, %v73_v48  ;;  %v104_v53 = vshrl.u32 %v73_v48, 16  ;;  %v69_v26 = vsel %vm63_vm4, %v66_v3, %v68_v18  ;;  %v185_v18 = vld [vmem:[%s292_s0] sm:$0xff] }
  0x20   :  { %v81_v50 = vand.u32 65535, %v77_v49  ;;  %v82_v51 = vshrl.u32 %v77_v49, 16  ;;  %v123_v30 = vmul.u32 %v247_v34, %v69_v26 }
  0x21   :  { %v105_v58 = vmul.u32 %v103_v52, %v79_v46  ;;  %v106_v59 = vmul.u32 %v104_v53, %v79_v46  ;;  %v107_v60 = vmul.u32 %v103_v52, %v80_v47  ;;  %v108_v0 = vmul.u32 %v104_v53, %v80_v47 }
  0x22   :  { %v83_v55 = vmul.u32 %v81_v50, %v79_v46  ;;  %v84_v56 = vmul.u32 %v82_v51, %v79_v46  ;;  %v85_v57 = vmul.u32 %v81_v50, %v80_v47  ;;  %v86_v61 = vmul.u32 %v82_v51, %v80_v47 }
  0x23   :  { %v109_v1 = vshll.u32 %v106_v59, 16  ;;  %v111_v2 = vshll.u32 %v107_v60, 16  ;;  %v110_v15 = vshrl.u32 %v106_v59, 16  ;;  %v112_v22 = vshrl.u32 %v107_v60, 16 }
  0x24   :  { %v87_v62 = vshll.u32 %v84_v56, 16  ;;  %v89_v63 = vshll.u32 %v85_v57, 16  ;;  %v88_v11 = vshrl.u32 %v84_v56, 16  ;;  %v90_v19 = vshrl.u32 %v85_v57, 16 }
  0x25   :  { %vm113_vm6 = vc.u32 %v105_v58, %v109_v1  ;;  %v115_v10 = vadd.s32 %v109_v1, %v105_v58 }
  0x26   :  { %vm91_vm5 = vc.u32 %v83_v55, %v87_v62  ;;  %v93_v4 = vadd.s32 %v87_v62, %v83_v55  ;;  %v114_v13 = vsel %vm113_vm6, 1, %v211_v7 }
  0x27   :  { %v92_v8 = vsel %vm91_vm5, 1, %v211_v7  ;;  %v116_v17 = vadd.s32 %v114_v13, %v108_v0  ;;  %vm117_vm8 = vc.u32 %v115_v10, %v111_v2  ;;  %v119_v25 = vadd.s32 %v115_v10, %v111_v2 }
  0x28   :  { %v94_v12 = vadd.s32 %v92_v8, %v86_v61  ;;  %vm95_vm7 = vc.u32 %v93_v4, %v89_v63  ;;  %v118_v21 = vsel %vm117_vm8, 1, %v211_v7 }
  0x29   :  { %v96_v14 = vsel %vm95_vm7, 1, %v211_v7  ;;  %v120_v23 = vadd.s32 %v118_v21, %v116_v17 }
  0x2a   :  { %v98_v20 = vadd.s32 %v96_v14, %v94_v12 }
  0x2b   :  { %v121_v27 = vadd.s32 %v120_v23, %v110_v15 }
  0x2c   :  { %v99_v24 = vadd.s32 %v98_v20, %v88_v11 }
  0x2d   :  { %v122_v29 = vadd.s32 %v121_v27, %v112_v22 }
  0x2e   :  { %v100_v28 = vadd.s32 %v99_v24, %v90_v19 }
  0x2f   :  { %v126_v31 = vadd.s32 1, %v122_v29 }
  0x30   :  { %vm125_vm9 = vc.u32 %v100_v28, %v119_v25  ;;  %v124_v16 = vadd.s32 %v119_v25, %v100_v28 }
  0x31   :  { %v127_v32 = vsel %vm125_vm9, %v126_v31, %v122_v29 }
  0x32   :  { %v128_v33 = vadd.s32 %v127_v32, %v123_v30 }
  0x34   :  { %v129_v35 = vadd.s32 536870912, %v128_v33 }
  0x36   :  { %v130_v36 = vshrl.u32 %v129_v35, 30 }
  0x38   :  { %v131_v37 = vshll.u32 %v130_v36, 30  ;;  %v154_v54 = vsub.s32 4, %v130_v36 }
  0x3a   :  { %v132_v38 = vsub.s32 %v128_v33, %v131_v37  ;;  %v155_v57 = vsel %vm32_vm12, %v154_v54, %v130_v36 }
  0x3b   :  { %v157_v60 = vsel %vm31_vm13, 0, %v155_v57 }
  0x3c   :  { %vm133_vm10 = vcmp.lt.s32.totalorder %v132_v38, 0  ;;  %v134_v39 = vsub.s32 0, %v132_v38  ;;  %v174_v1 = vadd.s32 3, %v157_v60 }
  0x3e   :  { %v135_v40 = vsel %vm133_vm10, %v134_v39, %v132_v38  ;;  %v175_v7 = vand.u32 3, %v174_v1 }
  0x3f   :  { %v136_v41 = vclz %v135_v40 }
  0x40   :  { %vm180_vm14 = vcmp.eq.s32.totalorder %v175_v7, 2  ;;  %vm177_vm15 = vcmp.eq.s32.totalorder %v175_v7, 0  ;;  %vm176_vm0 = vcmp.lt.s32.totalorder %v175_v7, 2 }
  0x41   :  { %v194_v42 = vadd.s32 4294967294, %v136_v41 }
  0x43   :  { %vm195_vm11 = vcmp.lt.s32.totalorder %v194_v42, 0 }
  0x44   :  { %v139_v43 = vsel %vm195_vm11, 0, %v194_v42 }
  0x45   :  { %v140_v44 = vsub.s32 32, %v139_v43  ;;  %v141_v45 = vshll.u32 %v132_v38, %v139_v43  ;;  %v144_v46 = vsub.s32 4294967266, %v139_v43 }
  0x47   :  { %v142_v34 = vshrl.u32 %v124_v16, %v140_v44  ;;  %v145_v47 = vadd.s32 127, %v144_v46 }
  0x49   :  { %v143_v48 = vor.u32 %v142_v34, %v141_v45  ;;  %v146_v49 = vshll.u32 %v145_v47, 23 }
  0x4b   :  { %v147_v50 = vor.u32 4788187, %v146_v49  ;;  %v150_v51 = vcvt.s32.f32 %v143_v48 }
  0x4d   :  { %v148_v52 = vand.u32 2147483647, %v147_v50 }
  0x4f   :  { %v151_v53 = vmul.f32 %v150_v51, %v148_v52 }
  0x51   :  { %v152_v55 = vxor.u32 2147483648, %v151_v53 }
  0x53   :  { %v153_v56 = vsel %vm32_vm12, %v152_v55, %v151_v53 }
  0x54   :  { %v156_v58 = vsel %vm31_vm13, %v238_v6, %v153_v56 }
  0x55   :  { %v158_v59 = vmul.f32 %v156_v58, %v156_v58 }
  0x57   :  { %v159_v61 = vmul.f32 -0.001358992, %v158_v59  ;;  %v166_v62 = vmul.f32 -0.00019511016, %v158_v59 }
  0x59   :  { %v160_v63 = vadd.f32 0.041655596, %v159_v61  ;;  %v167_v0 = vadd.f32 0.008332121, %v166_v62 }
  0x5b   :  { %v161_v2 = vmul.f32 %v160_v63, %v158_v59  ;;  %v168_v3 = vmul.f32 %v167_v0, %v158_v59 }
  0x5d   :  { %v162_v4 = vadd.f32 -0.4999988, %v161_v2  ;;  %v169_v5 = vadd.f32 -0.16666654, %v168_v3 }
  0x5f   :  { %v163_v8 = vmul.f32 %v162_v4, %v158_v59  ;;  %v170_v10 = vmul.f32 %v169_v5, %v158_v59 }
  0x61   :  { %v164_v9 = vadd.f32 1.0, %v163_v8  ;;  %v171_v11 = vadd.f32 1.0, %v170_v10 }
  0x63   :  { %v172_v12 = vmul.f32 %v171_v11, %v156_v58  ;;  %v181_v13 = vxor.u32 2147483648, %v164_v9 }
  0x65   :  { %v178_v14 = vxor.u32 2147483648, %v172_v12  ;;  %v182_v15 = vsel %vm180_vm14, %v181_v13, %v172_v12 }
  0x67   :  { %v179_v17 = vsel %vm177_vm15, %v164_v9, %v178_v14 }
  0x68   :  { %v183_v19 = vsel %vm176_vm0, %v179_v17, %v182_v15 }
  0x69   :  { %v184_v20 = vsel %vm173_vm1, nan, %v183_v19 }
  0x6a   :  { %v186_v21 = vadd.f32 %v185_v18, %v184_v20 }
  0x6c   :  { %188 = vst.msk [vmem:[%s293_s3] sm:$0xff] %vm187_vm2, %v186_v21 }

</bundles_post_ra>
